<compile_context>
chip_gen: v7x
topology: tpu7x:2x2x1
jax: 0.10.0
libtpu: 0.0.40
codegen_flags: <defaults>
</compile_context>

<pallas_src>
import functools

import jax
import jax.numpy as jnp
from jax.experimental import pallas as pl
from jax.experimental.pallas import tpu as pltpu


def _choose_row_tile(H, W, scales, max_block_elems):
    """Largest TH that divides H, is a multiple of max(8, 2**(scales-1)),
    and keeps TH*W <= max_block_elems.  Falls back to full H when H cannot be
    tiled cleanly (correctness is preserved; only tiling granularity changes)."""
    align = max(8, 1 << (scales - 1))
    if H % align != 0:
        return H
    candidates = [t for t in range(align, H + 1, align) if H % t == 0]
    fitting = [t for t in candidates if t * W <= max_block_elems]
    if fitting:
        return max(fitting)
    return min(candidates)


def _make_kernel(n_scales, TH, W, n_rows, tail_rows):
    def shift_up(x, step, axis):
        # result[i] = x[i + step] along `axis`, zero-filled at the end.  The
        # zero-filled region is always excluded by the validity selectors, so
        # full lane-aligned (TH, W) shapes are kept throughout.
        if axis == 0:
            if step >= TH:
                return jnp.zeros((TH, W), jnp.float32)
            return jnp.concatenate(
                [x[step:, :], jnp.zeros((step, W), jnp.float32)], axis=0)
        else:
            if step >= W:
                return jnp.zeros((TH, W), jnp.float32)
            return jnp.concatenate(
                [x[:, step:], jnp.zeros((TH, step), jnp.float32)], axis=1)

    def kernel(pred_ref, tgt_ref, mask_ref, loss_ref, msum_ref,
               acc_loss, acc_msum, tail_d, tail_m):
        row_i = pl.program_id(1)

        # In-kernel casts: no wrapper-side f32 materialisation pass over HBM.
        pred = pred_ref[0].astype(jnp.float32)
        tgt = tgt_ref[0].astype(jnp.float32)
        mask = mask_ref[0].astype(jnp.float32)
        diff = mask * (pred - tgt)

        rows = jax.lax.broadcasted_iota(jnp.int32, (TH, W), 0)
        cols = jax.lax.broadcasted_iota(jnp.int32, (TH, W), 1)
        slot_r = jax.lax.broadcasted_iota(jnp.int32, (8, 128), 0)
        slot_c = jax.lax.broadcasted_iota(jnp.int32, (8, 128), 1)

        @pl.when(row_i == 0)
        def _init():
            acc_loss[...] = jnp.zeros_like(acc_loss)
            acc_msum[...] = jnp.zeros_like(acc_msum)

        loss_delta = jnp.zeros((8, 128), jnp.float32)
        msum_delta = jnp.zeros((8, 128), jnp.float32)
        for s in range(n_scales):
            step = 1 << s
            sel_rc = None
            if step > 1:
                # positions belonging to this scale's subsampled grid
                sel_rc = ((rows & (step - 1)) == 0) & ((cols & (step - 1)) == 0)

            # x-direction gradient (full-res, selection-masked).
            gx = jnp.abs(shift_up(diff, step, 1) - diff) * (shift_up(mask, step, 1) * mask)
            sel_x = cols < (W - step)
            # y-direction gradient: pairs fully inside this row tile.
            gy = jnp.abs(shift_up(diff, step, 0) - diff) * (shift_up(mask, step, 0) * mask)
            sel_y = rows < (TH - step)
            if sel_rc is not None:
                sel_x = sel_x & sel_rc
                sel_y = sel_y & sel_rc

            # Fused x+y reduction: one full reduce per scale for the loss.
            tile_loss = jnp.sum(jnp.where(sel_x, gx, 0.0) + jnp.where(sel_y, gy, 0.0))
            tile_msum = (jnp.sum(mask) if sel_rc is None
                         else jnp.sum(jnp.where(sel_rc, mask, 0.0)))

            slot = (slot_r == 0) & (slot_c == s)
            loss_delta = loss_delta + jnp.where(slot, tile_loss, 0.0)
            msum_delta = msum_delta + jnp.where(slot, tile_msum, 0.0)

        acc_loss[...] += loss_delta
        acc_msum[...] += msum_delta

        if n_rows > 1:
            # y-gradient pairs straddling the row-tile boundary: exactly one
            # row pair per scale (previous tile's row TH-step with this tile's
            # row 0), because TH is a multiple of every step.
            @pl.when(row_i > 0)
            def _cross():
                cur_d = diff[0:1, :]
                cur_m = mask[0:1, :]
                col0 = cols[0:1, :]
                cross = jnp.zeros((8, 128), jnp.float32)
                for s in range(n_scales):
                    step = 1 << s
                    prev_d = tail_d[tail_rows - step:tail_rows - step + 1, :]
                    prev_m = tail_m[tail_rows - step:tail_rows - step + 1, :]
                    g = jnp.abs(cur_d - prev_d) * (cur_m * prev_m)
                    if step > 1:
                        val = jnp.sum(jnp.where((col0 & (step - 1)) == 0, g, 0.0))
                    else:
                        val = jnp.sum(g)
                    slot = (slot_r == 0) & (slot_c == s)
                    cross = cross + jnp.where(slot, val, 0.0)
                acc_loss[...] += cross

            # Stash the last rows of diff/mask for the next row tile.
            tail_d[...] = diff[TH - tail_rows:, :]
            tail_m[...] = mask[TH - tail_rows:, :]

        @pl.when(row_i == n_rows - 1)
        def _finalize():
            loss_ref[...] = acc_loss[...].reshape(1, 8, 128)
            msum_ref[...] = acc_msum[...].reshape(1, 8, 128)

    return kernel


@functools.partial(jax.jit, static_argnames=("scales", "max_block_elems"))
def gradient_loss_multiscale(prediction, target, mask, scales=4,
                             max_block_elems=128 * 1024):
    """GradientLoss.forward with reduction='batch-based'."""
    assert prediction.ndim == 3 and prediction.shape == target.shape == mask.shape
    B, H, W = prediction.shape
    n_scales = int(scales)
    assert n_scales >= 1

    TH = _choose_row_tile(H, W, n_scales, max_block_elems)
    n_rows = H // TH
    tail_rows = max(8, 1 << (n_scales - 1))

    kernel = _make_kernel(n_scales, TH, W, n_rows, tail_rows)

    block_bytes = TH * W * 4
    vmem_limit = int(max(32 * 2**20, min(100 * 2**20, 24 * block_bytes + (1 << 20))))

    in_spec = pl.BlockSpec((1, TH, W), lambda b, i: (b, i, 0))
    out_spec = pl.BlockSpec((1, 8, 128), lambda b, i: (b, 0, 0))

    bytes_accessed = int(prediction.size * prediction.dtype.itemsize
                         + target.size * target.dtype.itemsize
                         + mask.size * mask.dtype.itemsize
                         + 2 * B * 8 * 128 * 4)
    flops = int(n_scales * 20 * B * H * W)

    loss_blk, msum_blk = pl.pallas_call(
        kernel,
        out_shape=(jax.ShapeDtypeStruct((B, 8, 128), jnp.float32),
                   jax.ShapeDtypeStruct((B, 8, 128), jnp.float32)),
        grid_spec=pltpu.PrefetchScalarGridSpec(
            num_scalar_prefetch=0,
            grid=(B, n_rows),
            in_specs=[in_spec, in_spec, in_spec],
            out_specs=(out_spec, out_spec),
            scratch_shapes=[
                pltpu.VMEM((8, 128), jnp.float32),        # per-scale loss acc
                pltpu.VMEM((8, 128), jnp.float32),        # per-scale mask acc
                pltpu.VMEM((tail_rows, W), jnp.float32),  # carried diff tail
                pltpu.VMEM((tail_rows, W), jnp.float32),  # carried mask tail
            ]),
        compiler_params=pltpu.CompilerParams(
            dimension_semantics=("parallel", "arbitrary"),
            vmem_limit_bytes=vmem_limit),
        cost_estimate=pl.CostEstimate(flops=flops, transcendentals=0,
                                      bytes_accessed=bytes_accessed),
    )(prediction, target, mask)

    # Reduce per-batch partials in JAX; guard the divisor so no inf/nan forms.
    loss_per_scale = jnp.sum(loss_blk[:, 0, :n_scales], axis=0)
    msum_per_scale = jnp.sum(msum_blk[:, 0, :n_scales], axis=0)
    safe_div = jnp.where(msum_per_scale == 0.0, 1.0, msum_per_scale)
    per_scale = jnp.where(msum_per_scale == 0.0, 0.0, loss_per_scale / safe_div)
    return jnp.sum(per_scale)


# ---------------- Pure-JAX reference (mirrors the PyTorch code) ----------------
def _ref_single_scale(prediction, target, mask):
    diff = mask * (prediction - target)
    grad_x = jnp.abs(diff[:, :, 1:] - diff[:, :, :-1]) * (mask[:, :, 1:] * mask[:, :, :-1])
    grad_y = jnp.abs(diff[:, 1:, :] - diff[:, :-1, :]) * (mask[:, 1:, :] * mask[:, :-1, :])
    image_loss = jnp.sum(grad_x, axis=(1, 2)) + jnp.sum(grad_y, axis=(1, 2))
    divisor = jnp.sum(mask)
    return jnp.where(divisor == 0, 0.0, jnp.sum(image_loss) / divisor)


def _ref_multiscale(prediction, target, mask, scales=4):
    total = jnp.float32(0.0)
    for scale in range(scales):
        step = 2 ** scale
        total = total + _ref_single_scale(
            prediction[:, ::step, ::step],
            target[:, ::step, ::step],
            mask[:, ::step, ::step])
    return total


if __name__ == "__main__":
    key = jax.random.PRNGKey(0)
    k1, k2, k3, k4, k5, k6 = jax.random.split(key, 6)

    # Test 1: small single-row-tile case.
    B, H, W = 2, 16, 16
    pred = jax.random.normal(k1, (B, H, W), dtype=jnp.float32)
    tgt = jax.random.normal(k2, (B, H, W), dtype=jnp.float32)
    mask = (jax.random.uniform(k3, (B, H, W)) > 0.3).astype(jnp.float32)
    out1 = jax.block_until_ready(gradient_loss_multiscale(pred, tgt, mask))
    ref1 = _ref_multiscale(pred, tgt, mask, scales=4)
    assert jnp.allclose(out1, ref1, rtol=1e-5, atol=1e-5), (out1, ref1)

    # Test 2: force row tiling (TH=16 -> 2 row tiles) to exercise the
    # cross-row-tile y-gradient path and the gridded accumulation.
    B2, H2, W2 = 2, 32, 32
    pred2 = jax.random.normal(k4, (B2, H2, W2), dtype=jnp.float32)
    tgt2 = jax.random.normal(k5, (B2, H2, W2), dtype=jnp.float32)
    mask2 = (jax.random.uniform(k6, (B2, H2, W2)) > 0.4).astype(jnp.float32)
    out2 = jax.block_until_ready(
        gradient_loss_multiscale(pred2, tgt2, mask2, scales=4,
                                 max_block_elems=16 * W2))
    ref2 = _ref_multiscale(pred2, tgt2, mask2, scales=4)
    assert jnp.allclose(out2, ref2, rtol=1e-5, atol=1e-5), (out2, ref2)

    # Test 3: all-zero mask -> loss must be exactly 0 (no inf/nan).
    zmask = jnp.zeros((B, H, W), jnp.float32)
    out3 = jax.block_until_ready(gradient_loss_multiscale(pred, tgt, zmask))
    assert float(out3) == 0.0, out3

    print("KERNEL_OK")
</pallas_src>

<mosaic_0001>
module attributes {stable_mosaic.version = 11 : i64} {
  func.func @kernel(%arg0: i32, %arg1: i32, %arg2: memref<1x16x16xf32, #tpu.memory_space<vmem>>, %arg3: memref<1x16x16xf32, #tpu.memory_space<vmem>>, %arg4: memref<1x16x16xf32, #tpu.memory_space<vmem>>, %arg5: memref<1x8x128xf32, #tpu.memory_space<vmem>>, %arg6: memref<1x8x128xf32, #tpu.memory_space<vmem>>, %arg7: memref<8x128xf32, #tpu.memory_space<vmem>>, %arg8: memref<8x128xf32, #tpu.memory_space<vmem>>, %arg9: memref<8x16xf32, #tpu.memory_space<vmem>>, %arg10: memref<8x16xf32, #tpu.memory_space<vmem>>) attributes {dimension_semantics = [#tpu.dimension_semantics<parallel>, #tpu.dimension_semantics<arbitrary>], iteration_bounds = array<i64: 2, 1>, scalar_prefetch = 0 : i64, scratch_operands = 4 : i64, tpu.core_type = #tpu.core_type<tc>, window_params = [{transform_indices = @transform_0, window_bounds = array<i64: 1, 16, 16>}, {transform_indices = @transform_1, window_bounds = array<i64: 1, 16, 16>}, {transform_indices = @transform_2, window_bounds = array<i64: 1, 16, 16>}, {transform_indices = @transform_3, window_bounds = array<i64: 1, 8, 128>}, {transform_indices = @transform_4, window_bounds = array<i64: 1, 8, 128>}]} {
    %c0 = arith.constant 0 : index
    %c0_0 = arith.constant 0 : index
    %c0_1 = arith.constant 0 : index
    %0 = vector.load %arg2[%c0, %c0_0, %c0_1] : memref<1x16x16xf32, #tpu.memory_space<vmem>>, vector<1x16x16xf32>
    %1 = vector.shape_cast %0 : vector<1x16x16xf32> to vector<16x16xf32>
    %c0_2 = arith.constant 0 : index
    %c0_3 = arith.constant 0 : index
    %c0_4 = arith.constant 0 : index
    %2 = vector.load %arg3[%c0_2, %c0_3, %c0_4] : memref<1x16x16xf32, #tpu.memory_space<vmem>>, vector<1x16x16xf32>
    %3 = vector.shape_cast %2 : vector<1x16x16xf32> to vector<16x16xf32>
    %c0_5 = arith.constant 0 : index
    %c0_6 = arith.constant 0 : index
    %c0_7 = arith.constant 0 : index
    %4 = vector.load %arg4[%c0_5, %c0_6, %c0_7] : memref<1x16x16xf32, #tpu.memory_space<vmem>>, vector<1x16x16xf32>
    %5 = vector.shape_cast %4 : vector<1x16x16xf32> to vector<16x16xf32>
    %6 = arith.subf %1, %3 : vector<16x16xf32>
    %7 = arith.mulf %5, %6 : vector<16x16xf32>
    %8 = tpu.iota {dimensions = array<i32: 0>} : vector<16x16xi32>
    %9 = tpu.iota {dimensions = array<i32: 1>} : vector<16x16xi32>
    %10 = tpu.iota {dimensions = array<i32: 0>} : vector<8x128xi32>
    %11 = tpu.iota {dimensions = array<i32: 1>} : vector<8x128xi32>
    %c0_i32 = arith.constant 0 : i32
    %12 = arith.cmpi eq, %arg1, %c0_i32 : i32
    %13 = arith.extui %12 : i1 to i32
    %c0_i32_8 = arith.constant 0 : i32
    %14 = arith.cmpi ne, %13, %c0_i32_8 : i32
    scf.if %14 {
      %cst_83 = arith.constant 0.000000e+00 : f32
      %265 = vector.broadcast %cst_83 : f32 to vector<8x128xf32>
      %c0_84 = arith.constant 0 : index
      %c0_85 = arith.constant 0 : index
      %266 = vector.load %arg7[%c0_84, %c0_85] : memref<8x128xf32, #tpu.memory_space<vmem>>, vector<8x128xf32>
      tpu.vector_store %arg7[%c0_84, %c0_85], %265 {strides = array<i32>} : memref<8x128xf32, #tpu.memory_space<vmem>>, vector<8x128xf32>,
      %cst_86 = arith.constant 0.000000e+00 : f32
      %267 = vector.broadcast %cst_86 : f32 to vector<8x128xf32>
      %c0_87 = arith.constant 0 : index
      %c0_88 = arith.constant 0 : index
      %268 = vector.load %arg8[%c0_87, %c0_88] : memref<8x128xf32, #tpu.memory_space<vmem>>, vector<8x128xf32>
      tpu.vector_store %arg8[%c0_87, %c0_88], %267 {strides = array<i32>} : memref<8x128xf32, #tpu.memory_space<vmem>>, vector<8x128xf32>,
    } else {
    }
    %cst = arith.constant 0.000000e+00 : f32
    %15 = vector.broadcast %cst : f32 to vector<8x128xf32>
    %cst_9 = arith.constant 0.000000e+00 : f32
    %16 = vector.broadcast %cst_9 : f32 to vector<8x128xf32>
    %17 = vector.extract_strided_slice %7 {offsets = [0, 1], sizes = [16, 15], strides = [1, 1]} : vector<16x16xf32> to vector<16x15xf32>
    %cst_10 = arith.constant 0.000000e+00 : f32
    %18 = vector.broadcast %cst_10 : f32 to vector<16x1xf32>
    %19 = tpu.concatenate %17, %18 in 1 : vector<16x15xf32>, vector<16x1xf32> -> vector<16x16xf32>
    %20 = arith.subf %19, %7 : vector<16x16xf32>
    %21 = math.absf %20 : vector<16x16xf32>
    %22 = vector.extract_strided_slice %5 {offsets = [0, 1], sizes = [16, 15], strides = [1, 1]} : vector<16x16xf32> to vector<16x15xf32>
    %cst_11 = arith.constant 0.000000e+00 : f32
    %23 = vector.broadcast %cst_11 : f32 to vector<16x1xf32>
    %24 = tpu.concatenate %22, %23 in 1 : vector<16x15xf32>, vector<16x1xf32> -> vector<16x16xf32>
    %25 = arith.mulf %24, %5 : vector<16x16xf32>
    %26 = arith.mulf %21, %25 : vector<16x16xf32>
    %c15_i32 = arith.constant 15 : i32
    %27 = vector.broadcast %c15_i32 : i32 to vector<16x16xi32>
    %28 = arith.cmpi slt, %9, %27 : vector<16x16xi32>
    %29 = vector.extract_strided_slice %7 {offsets = [1, 0], sizes = [15, 16], strides = [1, 1]} : vector<16x16xf32> to vector<15x16xf32>
    %cst_12 = arith.constant 0.000000e+00 : f32
    %30 = vector.broadcast %cst_12 : f32 to vector<1x16xf32>
    %31 = tpu.concatenate %29, %30 in 0 : vector<15x16xf32>, vector<1x16xf32> -> vector<16x16xf32>
    %32 = arith.subf %31, %7 : vector<16x16xf32>
    %33 = math.absf %32 : vector<16x16xf32>
    %34 = vector.extract_strided_slice %5 {offsets = [1, 0], sizes = [15, 16], strides = [1, 1]} : vector<16x16xf32> to vector<15x16xf32>
    %cst_13 = arith.constant 0.000000e+00 : f32
    %35 = vector.broadcast %cst_13 : f32 to vector<1x16xf32>
    %36 = tpu.concatenate %34, %35 in 0 : vector<15x16xf32>, vector<1x16xf32> -> vector<16x16xf32>
    %37 = arith.mulf %36, %5 : vector<16x16xf32>
    %38 = arith.mulf %33, %37 : vector<16x16xf32>
    %c15_i32_14 = arith.constant 15 : i32
    %39 = vector.broadcast %c15_i32_14 : i32 to vector<16x16xi32>
    %40 = arith.cmpi slt, %8, %39 : vector<16x16xi32>
    %cst_15 = arith.constant 0.000000e+00 : f32
    %41 = vector.broadcast %cst_15 : f32 to vector<16x16xf32>
    %42 = arith.select %28, %26, %41 : vector<16x16xi1>, vector<16x16xf32>
    %cst_16 = arith.constant 0.000000e+00 : f32
    %43 = vector.broadcast %cst_16 : f32 to vector<16x16xf32>
    %44 = arith.select %40, %38, %43 : vector<16x16xi1>, vector<16x16xf32>
    %45 = arith.addf %42, %44 : vector<16x16xf32>
    %46 = vector.shape_cast %45 : vector<16x16xf32> to vector<1x16x16xf32>
    %cst_17 = arith.constant dense<0.000000e+00> : vector<1xf32>
    %47 = vector.multi_reduction <add>, %46, %cst_17 [1, 2] : vector<1x16x16xf32> to vector<1xf32>
    %48 = vector.shape_cast %47 : vector<1xf32> to vector<1x1x1xf32>
    %49 = vector.extract %48[0, 0, 0] : f32 from vector<1x1x1xf32>
    %50 = vector.shape_cast %5 : vector<16x16xf32> to vector<1x16x16xf32>
    %cst_18 = arith.constant dense<0.000000e+00> : vector<1xf32>
    %51 = vector.multi_reduction <add>, %50, %cst_18 [1, 2] : vector<1x16x16xf32> to vector<1xf32>
    %52 = vector.shape_cast %51 : vector<1xf32> to vector<1x1x1xf32>
    %53 = vector.extract %52[0, 0, 0] : f32 from vector<1x1x1xf32>
    %c0_i32_19 = arith.constant 0 : i32
    %54 = vector.broadcast %c0_i32_19 : i32 to vector<8x128xi32>
    %55 = arith.cmpi eq, %10, %54 : vector<8x128xi32>
    %c0_i32_20 = arith.constant 0 : i32
    %56 = vector.broadcast %c0_i32_20 : i32 to vector<8x128xi32>
    %57 = arith.cmpi eq, %11, %56 : vector<8x128xi32>
    %58 = arith.andi %55, %57 : vector<8x128xi1>
    %cst_21 = arith.constant 0.000000e+00 : f32
    %59 = vector.broadcast %49 : f32 to vector<8x128xf32>
    %60 = vector.broadcast %cst_21 : f32 to vector<8x128xf32>
    %61 = arith.select %58, %59, %60 : vector<8x128xi1>, vector<8x128xf32>
    %62 = arith.addf %15, %61 : vector<8x128xf32>
    %cst_22 = arith.constant 0.000000e+00 : f32
    %63 = vector.broadcast %53 : f32 to vector<8x128xf32>
    %64 = vector.broadcast %cst_22 : f32 to vector<8x128xf32>
    %65 = arith.select %58, %63, %64 : vector<8x128xi1>, vector<8x128xf32>
    %66 = arith.addf %16, %65 : vector<8x128xf32>
    %c1_i32 = arith.constant 1 : i32
    %67 = vector.broadcast %c1_i32 : i32 to vector<16x16xi32>
    %68 = arith.andi %8, %67 : vector<16x16xi32>
    %c0_i32_23 = arith.constant 0 : i32
    %69 = vector.broadcast %c0_i32_23 : i32 to vector<16x16xi32>
    %70 = arith.cmpi eq, %68, %69 : vector<16x16xi32>
    %c1_i32_24 = arith.constant 1 : i32
    %71 = vector.broadcast %c1_i32_24 : i32 to vector<16x16xi32>
    %72 = arith.andi %9, %71 : vector<16x16xi32>
    %c0_i32_25 = arith.constant 0 : i32
    %73 = vector.broadcast %c0_i32_25 : i32 to vector<16x16xi32>
    %74 = arith.cmpi eq, %72, %73 : vector<16x16xi32>
    %75 = arith.andi %70, %74 : vector<16x16xi1>
    %76 = vector.extract_strided_slice %7 {offsets = [0, 2], sizes = [16, 14], strides = [1, 1]} : vector<16x16xf32> to vector<16x14xf32>
    %cst_26 = arith.constant 0.000000e+00 : f32
    %77 = vector.broadcast %cst_26 : f32 to vector<16x2xf32>
    %78 = tpu.concatenate %76, %77 in 1 : vector<16x14xf32>, vector<16x2xf32> -> vector<16x16xf32>
    %79 = arith.subf %78, %7 : vector<16x16xf32>
    %80 = math.absf %79 : vector<16x16xf32>
    %81 = vector.extract_strided_slice %5 {offsets = [0, 2], sizes = [16, 14], strides = [1, 1]} : vector<16x16xf32> to vector<16x14xf32>
    %cst_27 = arith.constant 0.000000e+00 : f32
    %82 = vector.broadcast %cst_27 : f32 to vector<16x2xf32>
    %83 = tpu.concatenate %81, %82 in 1 : vector<16x14xf32>, vector<16x2xf32> -> vector<16x16xf32>
    %84 = arith.mulf %83, %5 : vector<16x16xf32>
    %85 = arith.mulf %80, %84 : vector<16x16xf32>
    %c14_i32 = arith.constant 14 : i32
    %86 = vector.broadcast %c14_i32 : i32 to vector<16x16xi32>
    %87 = arith.cmpi slt, %9, %86 : vector<16x16xi32>
    %88 = vector.extract_strided_slice %7 {offsets = [2, 0], sizes = [14, 16], strides = [1, 1]} : vector<16x16xf32> to vector<14x16xf32>
    %cst_28 = arith.constant 0.000000e+00 : f32
    %89 = vector.broadcast %cst_28 : f32 to vector<2x16xf32>
    %90 = tpu.concatenate %88, %89 in 0 : vector<14x16xf32>, vector<2x16xf32> -> vector<16x16xf32>
    %91 = arith.subf %90, %7 : vector<16x16xf32>
    %92 = math.absf %91 : vector<16x16xf32>
    %93 = vector.extract_strided_slice %5 {offsets = [2, 0], sizes = [14, 16], strides = [1, 1]} : vector<16x16xf32> to vector<14x16xf32>
    %cst_29 = arith.constant 0.000000e+00 : f32
    %94 = vector.broadcast %cst_29 : f32 to vector<2x16xf32>
    %95 = tpu.concatenate %93, %94 in 0 : vector<14x16xf32>, vector<2x16xf32> -> vector<16x16xf32>
    %96 = arith.mulf %95, %5 : vector<16x16xf32>
    %97 = arith.mulf %92, %96 : vector<16x16xf32>
    %c14_i32_30 = arith.constant 14 : i32
    %98 = vector.broadcast %c14_i32_30 : i32 to vector<16x16xi32>
    %99 = arith.cmpi slt, %8, %98 : vector<16x16xi32>
    %100 = arith.andi %87, %75 : vector<16x16xi1>
    %101 = arith.andi %99, %75 : vector<16x16xi1>
    %cst_31 = arith.constant 0.000000e+00 : f32
    %102 = vector.broadcast %cst_31 : f32 to vector<16x16xf32>
    %103 = arith.select %100, %85, %102 : vector<16x16xi1>, vector<16x16xf32>
    %cst_32 = arith.constant 0.000000e+00 : f32
    %104 = vector.broadcast %cst_32 : f32 to vector<16x16xf32>
    %105 = arith.select %101, %97, %104 : vector<16x16xi1>, vector<16x16xf32>
    %106 = arith.addf %103, %105 : vector<16x16xf32>
    %107 = vector.shape_cast %106 : vector<16x16xf32> to vector<1x16x16xf32>
    %cst_33 = arith.constant dense<0.000000e+00> : vector<1xf32>
    %108 = vector.multi_reduction <add>, %107, %cst_33 [1, 2] : vector<1x16x16xf32> to vector<1xf32>
    %109 = vector.shape_cast %108 : vector<1xf32> to vector<1x1x1xf32>
    %110 = vector.extract %109[0, 0, 0] : f32 from vector<1x1x1xf32>
    %cst_34 = arith.constant 0.000000e+00 : f32
    %111 = vector.broadcast %cst_34 : f32 to vector<16x16xf32>
    %112 = arith.select %75, %5, %111 : vector<16x16xi1>, vector<16x16xf32>
    %113 = vector.shape_cast %112 : vector<16x16xf32> to vector<1x16x16xf32>
    %cst_35 = arith.constant dense<0.000000e+00> : vector<1xf32>
    %114 = vector.multi_reduction <add>, %113, %cst_35 [1, 2] : vector<1x16x16xf32> to vector<1xf32>
    %115 = vector.shape_cast %114 : vector<1xf32> to vector<1x1x1xf32>
    %116 = vector.extract %115[0, 0, 0] : f32 from vector<1x1x1xf32>
    %c0_i32_36 = arith.constant 0 : i32
    %117 = vector.broadcast %c0_i32_36 : i32 to vector<8x128xi32>
    %118 = arith.cmpi eq, %10, %117 : vector<8x128xi32>
    %c1_i32_37 = arith.constant 1 : i32
    %119 = vector.broadcast %c1_i32_37 : i32 to vector<8x128xi32>
    %120 = arith.cmpi eq, %11, %119 : vector<8x128xi32>
    %121 = arith.andi %118, %120 : vector<8x128xi1>
    %cst_38 = arith.constant 0.000000e+00 : f32
    %122 = vector.broadcast %110 : f32 to vector<8x128xf32>
    %123 = vector.broadcast %cst_38 : f32 to vector<8x128xf32>
    %124 = arith.select %121, %122, %123 : vector<8x128xi1>, vector<8x128xf32>
    %125 = arith.addf %62, %124 : vector<8x128xf32>
    %cst_39 = arith.constant 0.000000e+00 : f32
    %126 = vector.broadcast %116 : f32 to vector<8x128xf32>
    %127 = vector.broadcast %cst_39 : f32 to vector<8x128xf32>
    %128 = arith.select %121, %126, %127 : vector<8x128xi1>, vector<8x128xf32>
    %129 = arith.addf %66, %128 : vector<8x128xf32>
    %c3_i32 = arith.constant 3 : i32
    %130 = vector.broadcast %c3_i32 : i32 to vector<16x16xi32>
    %131 = arith.andi %8, %130 : vector<16x16xi32>
    %c0_i32_40 = arith.constant 0 : i32
    %132 = vector.broadcast %c0_i32_40 : i32 to vector<16x16xi32>
    %133 = arith.cmpi eq, %131, %132 : vector<16x16xi32>
    %c3_i32_41 = arith.constant 3 : i32
    %134 = vector.broadcast %c3_i32_41 : i32 to vector<16x16xi32>
    %135 = arith.andi %9, %134 : vector<16x16xi32>
    %c0_i32_42 = arith.constant 0 : i32
    %136 = vector.broadcast %c0_i32_42 : i32 to vector<16x16xi32>
    %137 = arith.cmpi eq, %135, %136 : vector<16x16xi32>
    %138 = arith.andi %133, %137 : vector<16x16xi1>
    %139 = vector.extract_strided_slice %7 {offsets = [0, 4], sizes = [16, 12], strides = [1, 1]} : vector<16x16xf32> to vector<16x12xf32>
    %cst_43 = arith.constant 0.000000e+00 : f32
    %140 = vector.broadcast %cst_43 : f32 to vector<16x4xf32>
    %141 = tpu.concatenate %139, %140 in 1 : vector<16x12xf32>, vector<16x4xf32> -> vector<16x16xf32>
    %142 = arith.subf %141, %7 : vector<16x16xf32>
    %143 = math.absf %142 : vector<16x16xf32>
    %144 = vector.extract_strided_slice %5 {offsets = [0, 4], sizes = [16, 12], strides = [1, 1]} : vector<16x16xf32> to vector<16x12xf32>
    %cst_44 = arith.constant 0.000000e+00 : f32
    %145 = vector.broadcast %cst_44 : f32 to vector<16x4xf32>
    %146 = tpu.concatenate %144, %145 in 1 : vector<16x12xf32>, vector<16x4xf32> -> vector<16x16xf32>
    %147 = arith.mulf %146, %5 : vector<16x16xf32>
    %148 = arith.mulf %143, %147 : vector<16x16xf32>
    %c12_i32 = arith.constant 12 : i32
    %149 = vector.broadcast %c12_i32 : i32 to vector<16x16xi32>
    %150 = arith.cmpi slt, %9, %149 : vector<16x16xi32>
    %151 = vector.extract_strided_slice %7 {offsets = [4, 0], sizes = [12, 16], strides = [1, 1]} : vector<16x16xf32> to vector<12x16xf32>
    %cst_45 = arith.constant 0.000000e+00 : f32
    %152 = vector.broadcast %cst_45 : f32 to vector<4x16xf32>
    %153 = tpu.concatenate %151, %152 in 0 : vector<12x16xf32>, vector<4x16xf32> -> vector<16x16xf32>
    %154 = arith.subf %153, %7 : vector<16x16xf32>
    %155 = math.absf %154 : vector<16x16xf32>
    %156 = vector.extract_strided_slice %5 {offsets = [4, 0], sizes = [12, 16], strides = [1, 1]} : vector<16x16xf32> to vector<12x16xf32>
    %cst_46 = arith.constant 0.000000e+00 : f32
    %157 = vector.broadcast %cst_46 : f32 to vector<4x16xf32>
    %158 = tpu.concatenate %156, %157 in 0 : vector<12x16xf32>, vector<4x16xf32> -> vector<16x16xf32>
    %159 = arith.mulf %158, %5 : vector<16x16xf32>
    %160 = arith.mulf %155, %159 : vector<16x16xf32>
    %c12_i32_47 = arith.constant 12 : i32
    %161 = vector.broadcast %c12_i32_47 : i32 to vector<16x16xi32>
    %162 = arith.cmpi slt, %8, %161 : vector<16x16xi32>
    %163 = arith.andi %150, %138 : vector<16x16xi1>
    %164 = arith.andi %162, %138 : vector<16x16xi1>
    %cst_48 = arith.constant 0.000000e+00 : f32
    %165 = vector.broadcast %cst_48 : f32 to vector<16x16xf32>
    %166 = arith.select %163, %148, %165 : vector<16x16xi1>, vector<16x16xf32>
    %cst_49 = arith.constant 0.000000e+00 : f32
    %167 = vector.broadcast %cst_49 : f32 to vector<16x16xf32>
    %168 = arith.select %164, %160, %167 : vector<16x16xi1>, vector<16x16xf32>
    %169 = arith.addf %166, %168 : vector<16x16xf32>
    %170 = vector.shape_cast %169 : vector<16x16xf32> to vector<1x16x16xf32>
    %cst_50 = arith.constant dense<0.000000e+00> : vector<1xf32>
    %171 = vector.multi_reduction <add>, %170, %cst_50 [1, 2] : vector<1x16x16xf32> to vector<1xf32>
    %172 = vector.shape_cast %171 : vector<1xf32> to vector<1x1x1xf32>
    %173 = vector.extract %172[0, 0, 0] : f32 from vector<1x1x1xf32>
    %cst_51 = arith.constant 0.000000e+00 : f32
    %174 = vector.broadcast %cst_51 : f32 to vector<16x16xf32>
    %175 = arith.select %138, %5, %174 : vector<16x16xi1>, vector<16x16xf32>
    %176 = vector.shape_cast %175 : vector<16x16xf32> to vector<1x16x16xf32>
    %cst_52 = arith.constant dense<0.000000e+00> : vector<1xf32>
    %177 = vector.multi_reduction <add>, %176, %cst_52 [1, 2] : vector<1x16x16xf32> to vector<1xf32>
    %178 = vector.shape_cast %177 : vector<1xf32> to vector<1x1x1xf32>
    %179 = vector.extract %178[0, 0, 0] : f32 from vector<1x1x1xf32>
    %c0_i32_53 = arith.constant 0 : i32
    %180 = vector.broadcast %c0_i32_53 : i32 to vector<8x128xi32>
    %181 = arith.cmpi eq, %10, %180 : vector<8x128xi32>
    %c2_i32 = arith.constant 2 : i32
    %182 = vector.broadcast %c2_i32 : i32 to vector<8x128xi32>
    %183 = arith.cmpi eq, %11, %182 : vector<8x128xi32>
    %184 = arith.andi %181, %183 : vector<8x128xi1>
    %cst_54 = arith.constant 0.000000e+00 : f32
    %185 = vector.broadcast %173 : f32 to vector<8x128xf32>
    %186 = vector.broadcast %cst_54 : f32 to vector<8x128xf32>
    %187 = arith.select %184, %185, %186 : vector<8x128xi1>, vector<8x128xf32>
    %188 = arith.addf %125, %187 : vector<8x128xf32>
    %cst_55 = arith.constant 0.000000e+00 : f32
    %189 = vector.broadcast %179 : f32 to vector<8x128xf32>
    %190 = vector.broadcast %cst_55 : f32 to vector<8x128xf32>
    %191 = arith.select %184, %189, %190 : vector<8x128xi1>, vector<8x128xf32>
    %192 = arith.addf %129, %191 : vector<8x128xf32>
    %c7_i32 = arith.constant 7 : i32
    %193 = vector.broadcast %c7_i32 : i32 to vector<16x16xi32>
    %194 = arith.andi %8, %193 : vector<16x16xi32>
    %c0_i32_56 = arith.constant 0 : i32
    %195 = vector.broadcast %c0_i32_56 : i32 to vector<16x16xi32>
    %196 = arith.cmpi eq, %194, %195 : vector<16x16xi32>
    %c7_i32_57 = arith.constant 7 : i32
    %197 = vector.broadcast %c7_i32_57 : i32 to vector<16x16xi32>
    %198 = arith.andi %9, %197 : vector<16x16xi32>
    %c0_i32_58 = arith.constant 0 : i32
    %199 = vector.broadcast %c0_i32_58 : i32 to vector<16x16xi32>
    %200 = arith.cmpi eq, %198, %199 : vector<16x16xi32>
    %201 = arith.andi %196, %200 : vector<16x16xi1>
    %202 = vector.extract_strided_slice %7 {offsets = [0, 8], sizes = [16, 8], strides = [1, 1]} : vector<16x16xf32> to vector<16x8xf32>
    %cst_59 = arith.constant 0.000000e+00 : f32
    %203 = vector.broadcast %cst_59 : f32 to vector<16x8xf32>
    %204 = tpu.concatenate %202, %203 in 1 : vector<16x8xf32>, vector<16x8xf32> -> vector<16x16xf32>
    %205 = arith.subf %204, %7 : vector<16x16xf32>
    %206 = math.absf %205 : vector<16x16xf32>
    %207 = vector.extract_strided_slice %5 {offsets = [0, 8], sizes = [16, 8], strides = [1, 1]} : vector<16x16xf32> to vector<16x8xf32>
    %cst_60 = arith.constant 0.000000e+00 : f32
    %208 = vector.broadcast %cst_60 : f32 to vector<16x8xf32>
    %209 = tpu.concatenate %207, %208 in 1 : vector<16x8xf32>, vector<16x8xf32> -> vector<16x16xf32>
    %210 = arith.mulf %209, %5 : vector<16x16xf32>
    %211 = arith.mulf %206, %210 : vector<16x16xf32>
    %c8_i32 = arith.constant 8 : i32
    %212 = vector.broadcast %c8_i32 : i32 to vector<16x16xi32>
    %213 = arith.cmpi slt, %9, %212 : vector<16x16xi32>
    %214 = vector.extract_strided_slice %7 {offsets = [8, 0], sizes = [8, 16], strides = [1, 1]} : vector<16x16xf32> to vector<8x16xf32>
    %cst_61 = arith.constant 0.000000e+00 : f32
    %215 = vector.broadcast %cst_61 : f32 to vector<8x16xf32>
    %216 = tpu.concatenate %214, %215 in 0 : vector<8x16xf32>, vector<8x16xf32> -> vector<16x16xf32>
    %217 = arith.subf %216, %7 : vector<16x16xf32>
    %218 = math.absf %217 : vector<16x16xf32>
    %219 = vector.extract_strided_slice %5 {offsets = [8, 0], sizes = [8, 16], strides = [1, 1]} : vector<16x16xf32> to vector<8x16xf32>
    %cst_62 = arith.constant 0.000000e+00 : f32
    %220 = vector.broadcast %cst_62 : f32 to vector<8x16xf32>
    %221 = tpu.concatenate %219, %220 in 0 : vector<8x16xf32>, vector<8x16xf32> -> vector<16x16xf32>
    %222 = arith.mulf %221, %5 : vector<16x16xf32>
    %223 = arith.mulf %218, %222 : vector<16x16xf32>
    %c8_i32_63 = arith.constant 8 : i32
    %224 = vector.broadcast %c8_i32_63 : i32 to vector<16x16xi32>
    %225 = arith.cmpi slt, %8, %224 : vector<16x16xi32>
    %226 = arith.andi %213, %201 : vector<16x16xi1>
    %227 = arith.andi %225, %201 : vector<16x16xi1>
    %cst_64 = arith.constant 0.000000e+00 : f32
    %228 = vector.broadcast %cst_64 : f32 to vector<16x16xf32>
    %229 = arith.select %226, %211, %228 : vector<16x16xi1>, vector<16x16xf32>
    %cst_65 = arith.constant 0.000000e+00 : f32
    %230 = vector.broadcast %cst_65 : f32 to vector<16x16xf32>
    %231 = arith.select %227, %223, %230 : vector<16x16xi1>, vector<16x16xf32>
    %232 = arith.addf %229, %231 : vector<16x16xf32>
    %233 = vector.shape_cast %232 : vector<16x16xf32> to vector<1x16x16xf32>
    %cst_66 = arith.constant dense<0.000000e+00> : vector<1xf32>
    %234 = vector.multi_reduction <add>, %233, %cst_66 [1, 2] : vector<1x16x16xf32> to vector<1xf32>
    %235 = vector.shape_cast %234 : vector<1xf32> to vector<1x1x1xf32>
    %236 = vector.extract %235[0, 0, 0] : f32 from vector<1x1x1xf32>
    %cst_67 = arith.constant 0.000000e+00 : f32
    %237 = vector.broadcast %cst_67 : f32 to vector<16x16xf32>
    %238 = arith.select %201, %5, %237 : vector<16x16xi1>, vector<16x16xf32>
    %239 = vector.shape_cast %238 : vector<16x16xf32> to vector<1x16x16xf32>
    %cst_68 = arith.constant dense<0.000000e+00> : vector<1xf32>
    %240 = vector.multi_reduction <add>, %239, %cst_68 [1, 2] : vector<1x16x16xf32> to vector<1xf32>
    %241 = vector.shape_cast %240 : vector<1xf32> to vector<1x1x1xf32>
    %242 = vector.extract %241[0, 0, 0] : f32 from vector<1x1x1xf32>
    %c0_i32_69 = arith.constant 0 : i32
    %243 = vector.broadcast %c0_i32_69 : i32 to vector<8x128xi32>
    %244 = arith.cmpi eq, %10, %243 : vector<8x128xi32>
    %c3_i32_70 = arith.constant 3 : i32
    %245 = vector.broadcast %c3_i32_70 : i32 to vector<8x128xi32>
    %246 = arith.cmpi eq, %11, %245 : vector<8x128xi32>
    %247 = arith.andi %244, %246 : vector<8x128xi1>
    %cst_71 = arith.constant 0.000000e+00 : f32
    %248 = vector.broadcast %236 : f32 to vector<8x128xf32>
    %249 = vector.broadcast %cst_71 : f32 to vector<8x128xf32>
    %250 = arith.select %247, %248, %249 : vector<8x128xi1>, vector<8x128xf32>
    %251 = arith.addf %188, %250 : vector<8x128xf32>
    %cst_72 = arith.constant 0.000000e+00 : f32
    %252 = vector.broadcast %242 : f32 to vector<8x128xf32>
    %253 = vector.broadcast %cst_72 : f32 to vector<8x128xf32>
    %254 = arith.select %247, %252, %253 : vector<8x128xi1>, vector<8x128xf32>
    %255 = arith.addf %192, %254 : vector<8x128xf32>
    %c0_73 = arith.constant 0 : index
    %c0_74 = arith.constant 0 : index
    %256 = vector.load %arg7[%c0_73, %c0_74] : memref<8x128xf32, #tpu.memory_space<vmem>>, vector<8x128xf32>
    %257 = arith.addf %256, %251 : vector<8x128xf32>
    %c0_75 = arith.constant 0 : index
    %c0_76 = arith.constant 0 : index
    %258 = vector.load %arg7[%c0_75, %c0_76] : memref<8x128xf32, #tpu.memory_space<vmem>>, vector<8x128xf32>
    tpu.vector_store %arg7[%c0_75, %c0_76], %257 {strides = array<i32>} : memref<8x128xf32, #tpu.memory_space<vmem>>, vector<8x128xf32>,
    %c0_77 = arith.constant 0 : index
    %c0_78 = arith.constant 0 : index
    %259 = vector.load %arg8[%c0_77, %c0_78] : memref<8x128xf32, #tpu.memory_space<vmem>>, vector<8x128xf32>
    %260 = arith.addf %259, %255 : vector<8x128xf32>
    %c0_79 = arith.constant 0 : index
    %c0_80 = arith.constant 0 : index
    %261 = vector.load %arg8[%c0_79, %c0_80] : memref<8x128xf32, #tpu.memory_space<vmem>>, vector<8x128xf32>
    tpu.vector_store %arg8[%c0_79, %c0_80], %260 {strides = array<i32>} : memref<8x128xf32, #tpu.memory_space<vmem>>, vector<8x128xf32>,
    %c0_i32_81 = arith.constant 0 : i32
    %262 = arith.cmpi eq, %arg1, %c0_i32_81 : i32
    %263 = arith.extui %262 : i1 to i32
    %c0_i32_82 = arith.constant 0 : i32
    %264 = arith.cmpi ne, %263, %c0_i32_82 : i32
    scf.if %264 {
      %c0_83 = arith.constant 0 : index
      %c0_84 = arith.constant 0 : index
      %265 = vector.load %arg7[%c0_83, %c0_84] : memref<8x128xf32, #tpu.memory_space<vmem>>, vector<8x128xf32>
      %266 = vector.shape_cast %265 : vector<8x128xf32> to vector<1x8x128xf32>
      %c0_85 = arith.constant 0 : index
      %c0_86 = arith.constant 0 : index
      %c0_87 = arith.constant 0 : index
      %267 = vector.load %arg5[%c0_85, %c0_86, %c0_87] : memref<1x8x128xf32, #tpu.memory_space<vmem>>, vector<1x8x128xf32>
      tpu.vector_store %arg5[%c0_85, %c0_86, %c0_87], %266 {strides = array<i32>} : memref<1x8x128xf32, #tpu.memory_space<vmem>>, vector<1x8x128xf32>,
      %c0_88 = arith.constant 0 : index
      %c0_89 = arith.constant 0 : index
      %268 = vector.load %arg8[%c0_88, %c0_89] : memref<8x128xf32, #tpu.memory_space<vmem>>, vector<8x128xf32>
      %269 = vector.shape_cast %268 : vector<8x128xf32> to vector<1x8x128xf32>
      %c0_90 = arith.constant 0 : index
      %c0_91 = arith.constant 0 : index
      %c0_92 = arith.constant 0 : index
      %270 = vector.load %arg6[%c0_90, %c0_91, %c0_92] : memref<1x8x128xf32, #tpu.memory_space<vmem>>, vector<1x8x128xf32>
      tpu.vector_store %arg6[%c0_90, %c0_91, %c0_92], %269 {strides = array<i32>} : memref<1x8x128xf32, #tpu.memory_space<vmem>>, vector<1x8x128xf32>,
    } else {
    }
    return
  }
  func.func @transform_0(%arg0: i32, %arg1: i32) -> (i32, i32, i32) {
    %c0_i32 = arith.constant 0 : i32
    %c0_i32_0 = arith.constant 0 : i32
    return %arg0, %arg1, %c0_i32 : i32, i32, i32
  }
  func.func @transform_1(%arg0: i32, %arg1: i32) -> (i32, i32, i32) {
    %c0_i32 = arith.constant 0 : i32
    %c0_i32_0 = arith.constant 0 : i32
    return %arg0, %arg1, %c0_i32 : i32, i32, i32
  }
  func.func @transform_2(%arg0: i32, %arg1: i32) -> (i32, i32, i32) {
    %c0_i32 = arith.constant 0 : i32
    %c0_i32_0 = arith.constant 0 : i32
    return %arg0, %arg1, %c0_i32 : i32, i32, i32
  }
  func.func @transform_3(%arg0: i32, %arg1: i32) -> (i32, i32, i32) {
    %c0_i32 = arith.constant 0 : i32
    %c0_i32_0 = arith.constant 0 : i32
    %c0_i32_1 = arith.constant 0 : i32
    return %arg0, %c0_i32, %c0_i32_0 : i32, i32, i32
  }
  func.func @transform_4(%arg0: i32, %arg1: i32) -> (i32, i32, i32) {
    %c0_i32 = arith.constant 0 : i32
    %c0_i32_0 = arith.constant 0 : i32
    %c0_i32_1 = arith.constant 0 : i32
    return %arg0, %c0_i32, %c0_i32_0 : i32, i32, i32
  }
}

</mosaic_0001>

<bundles_post_ra>
// kernel: gradient_loss_multiscale.1
= control target key start
LH: loop header
LB: loop body
LE: loop exit
PB: predicated region body
PF: predicated region fallthrough
CT: control target
= control target key end

     0   :  { %10 = vsyncpa [#allocation7], 0  ;;  %s1740_s0 = inlined_call_operand.hbm [shape: f32[2,16,16], index: 0, kind: input, shape index: {}]   ;;  %s1741_s1 = inlined_call_operand.hbm [shape: f32[2,16,16], index: 1, kind: input, shape index: {}]   ;;  %s1742_s2 = inlined_call_operand.hbm [shape: f32[2,16,16], index: 2, kind: input, shape index: {}]   ;;  %s1743_s3 = inlined_call_operand.vmem [shape: f32[2,8,128], index: 3, kind: output, shape index: {0}]   ;;  %s1744_s4 = inlined_call_operand.vmem [shape: f32[2,8,128], index: 4, kind: output, shape index: {1}]  }
   0x1   :  { %12 = vsyncpa [#allocation7 + $0x1], 0 }
   0x2   :  { %13 = vsyncpa [#allocation9], 0 }
   0x3   :  { %15 = vsyncpa [#allocation9 + $0x1], 0  ;;  %s1195_s15 = smov 0   ;;  %s1197_s16 = smov 0  }
   0x4   :  { %s1199_s17 = smov 0   ;;  %s1201_s18 = smov 0  }
   0x5   :  { %s1203_s19 = smov 0   ;;  %s1205_s20 = smov 0  }
   0x6 LB: > { %s1746_s21 = sadd.s32 4294967295, %s1159_s20   ;;  %s33_s22 = sadd.s32 1, %s1155_s19  ;;  %s1159_s20 = sphi %s1205_s20, %s21_s20   ;;  %s1155_s19 = sphi %s1203_s19, %s1798_s19   ;;  %s1151_s18 = sphi %s1201_s18, %s1797_s18   ;;  %s1147_s17 = sphi %s1199_s17, %s1796_s17   ;;  %s1143_s16 = sphi %s1197_s16, %s1795_s16   ;;  %s1139_s15 = sphi %s1195_s15, %s1794_s15  }
   0x7   : > { %p35_p0 = scmp.ge.s32.totalorder %s33_s22, 2  ;;  %s42_s23 = sadd.s32 1, %s1147_s17 }
   0x8   : > { %p49_p1 = scmp.ne.s32.totalorder %s1147_s17, %s1143_s16  ;;  %p50_p2 = scmp.eq.s32.totalorder %s1159_s20, 0 }
   0x9   : > { %s1800_s22 = smov (%p35_p0, %s33_s22), 0  ;;  %p55_p4 = scmp.ne.s32.totalorder %s1143_s16, %s1139_s15 }
   0xa   : > { %p51_p3 = por %p50_p2, %p49_p1  ;;  %s37_s24 = ssub.s32 %s1155_s19, %s1800_s22 }
   0xb   : > { %p56_p5 = scmp.eq.s32.totalorder %s1746_s21, 0  ;;  %p40_p6 = scmp.eq.s32.totalorder %s37_s24, 0 }
   0xc   : > { %p960_p8 = scmp.lt.s32.totalorder %s1159_s20, 2  ;;  %s187_s27 = sand.u32 1, %s1147_s17  }
   0xd   : > { %p1236_p7 = por %p56_p5, %p55_p4  ;;  %s1246_s28 = sshll.u32 %s1155_s19, 8 }
   0xe   : > { %s1242_s26 = scalar_select %p40_p6, %s1147_s17, %s42_s23  }
   0xf   : > { %s1749_s25 = scalar_select %p1236_p7, 1, 0 }
  0x10   : > { %s1250_s29 = sshll.u32 %s187_s27, 4  ;;  %p1252_p9 = pnand %p960_p8, %p51_p3 }
  0x11   : > { %s210_s5 = sand.u32 1, %s1159_s20   ;;  %s1261_s8 = scalar_lea.hbm %s1741_s1, %s1246_s28 }
  0x12   : > { %s214_s9 = scalar_lea.vmem [#allocation8], %s1250_s29  ;;  %s1267_s11 = scalar_lea.sflag [#allocation9], %s210_s5 }
  0x13   : > { %s223_s10 = sshll.u32 %s214_s9, 4  ;;  %s1015_s12 = scalar_lea.hbm %s1261_s8, 256  ;;  %s1264_s10 = int_to_ptr.vmem [resolvable:$true] %s223_s10 }
  0x14   : > { %p1016_p11 = scmp.ne.s32.totalorder %s1261_s8, %s1015_s12  ;;  %p1273_p12 = pneg %p1252_p9 }
  0x15   : > { %s1020_s23 = scalar_lea.hbm %s1741_s1, 512  ;;  %p1021_p1 = scmp.lt.u32.totalorder %s1261_s8, %s1741_s1 }
  0x16   : > { %p1018_p13 = pnand %p1273_p12, %p1016_p11  ;;  %p1022_p2 = scmp.lt.u32.totalorder %s1020_s23, %s1015_s12 }
  0x17   : > { %p1024_p4 = scmp.lt.u32.totalorder %s1015_s12, %s1261_s8 }
  0x18   : > { %p1019_p0 = pneg %p1018_p13  ;;  %p1023_p3 = por %p1022_p2, %p1021_p1 }
  0x1a   : > { %p1025_p5 = por %p1024_p4, %p1023_p3 }
  0x1c   : > { %p1026_p6 = pnand %p1025_p5, %p1019_p0 }
  0x1e   : > { %1029 = shalt.err (!%p1026_p6)
}
  0x1f   : > { %s1030_s5 = scalar_lea.vmem %s1264_s10, 256  ;;  %s1161_s7 = smov [#allocation8]  }
  0x20   : > { %p1031_p8 = scmp.ne.s32.totalorder %s1264_s10, %s1030_s5  ;;  %s1035_s9 = sshll.u32 %s1161_s7, 4  ;;  %s1036_s9 = int_to_ptr.vmem [resolvable:$false] %s1035_s9 }
  0x21   : > { %s1037_s14 = scalar_lea.vmem %s1036_s9, 512  ;;  %p1038_p10 = scmp.lt.s32.totalorder %s1264_s10, %s1036_s9 }
  0x22   : > { %p1033_p11 = pnand %p1031_p8, %p1273_p12  ;;  %p1039_p7 = scmp.lt.s32.totalorder %s1037_s14, %s1030_s5 }
  0x24   : > { %p1034_p13 = pneg %p1033_p11  ;;  %p1040_p1 = por %p1039_p7, %p1038_p10 }
  0x26   : > { %p1041_p2 = pnand %p1040_p1, %p1034_p13 }
  0x28   : > { %1044 = shalt.err (!%p1041_p2)
}
  0x29   : > { %s1747_s12 = smov 128   ;;  %s1163_s15 = smov 8  }
  0x2a   : > { %956 = dma.hbm_to_vmem [thread:$0]  (!%p1252_p9), %s1261_s8, 256, %s1264_s10, %s1267_s11, %s1747_s12, %s1747_s12, %s1163_s15  }
  0x2b   : > { %p254_p7 = scmp.lt.s32.totalorder %s1159_s20, 3  ;;  %p1752_p10 = scmp.ge.s32.totalorder %s1159_s20, 1 }
  0x2c   : > { %s1311_s5 = scalar_lea.hbm %s1740_s0, %s1246_s28  ;;  %s191_s7 = scalar_lea.vmem [#allocation6], %s1250_s29 }
  0x2d   : > { %p1303_p0 = pnand %p1752_p10, %p254_p7  ;;  %s200_s9 = sshll.u32 %s191_s7, 4  ;;  %s1314_s9 = int_to_ptr.vmem [resolvable:$true] %s200_s9 }
  0x2e   : > { %s1318_s8 = scalar_lea.sflag [#allocation7], %s187_s27  ;;  %s1045_s10 = scalar_lea.hbm %s1311_s5, 256 }
  0x2f   : > { %s1753_s23 = scalar_select %p1303_p0, 1, 0 }
  0x30   : > { %p1046_p3 = scmp.ne.s32.totalorder %s1311_s5, %s1045_s10  ;;  %s1050_s6 = scalar_lea.hbm %s1740_s0, 512 }
  0x31   : > { %p1051_p6 = scmp.lt.u32.totalorder %s1311_s5, %s1740_s0  ;;  %p1052_p8 = scmp.lt.u32.totalorder %s1050_s6, %s1045_s10 }
  0x32   : > { %p1048_p4 = pnand %p1046_p3, %p1273_p12  ;;  %p1054_p13 = scmp.lt.u32.totalorder %s1045_s10, %s1311_s5 }
  0x33   : > { %p1053_p11 = por %p1052_p8, %p1051_p6 }
  0x34   : > { %p1049_p5 = pneg %p1048_p4 }
  0x35   : > { %p1055_p1 = por %p1054_p13, %p1053_p11 }
  0x37   : > { %p1056_p2 = pnand %p1055_p1, %p1049_p5 }
  0x39   : > { %1059 = shalt.err (!%p1056_p2)
}
  0x3a   : > { %s1060_s27 = scalar_lea.vmem %s1314_s9, 256  ;;  %s1164_s7 = smov [#allocation6]  }
  0x3b   : > { %p1061_p7 = scmp.ne.s32.totalorder %s1314_s9, %s1060_s27  ;;  %s1065_s14 = sshll.u32 %s1164_s7, 4  ;;  %s1066_s14 = int_to_ptr.vmem [resolvable:$false] %s1065_s14 }
  0x3c   : > { %s1067_s21 = scalar_lea.vmem %s1066_s14, 512  ;;  %p1068_p4 = scmp.lt.s32.totalorder %s1314_s9, %s1066_s14 }
  0x3d   : > { %p1063_p10 = pnand %p1061_p7, %p1273_p12  ;;  %p1069_p0 = scmp.lt.s32.totalorder %s1067_s21, %s1060_s27 }
  0x3f   : > { %p1064_p3 = pneg %p1063_p10  ;;  %p1070_p6 = por %p1069_p0, %p1068_p4 }
  0x41   : > { %p1071_p8 = pnand %p1070_p6, %p1064_p3 }
  0x43   : > { %1074 = shalt.err (!%p1071_p8)
}
  0x44   : > { %s1754_s12 = smov 128   ;;  %s1349_s6 = scalar_lea.hbm %s1742_s2, %s1246_s28 }
  0x45   : > { %953 = dma.hbm_to_vmem [thread:$0]  (!%p1252_p9), %s1311_s5, 256, %s1314_s9, %s1318_s8, %s1754_s12, %s1754_s12, %s1163_s15  }
  0x46   : > { %s237_s27 = scalar_lea.vmem [#allocation10], %s1250_s29  ;;  %s1075_s14 = scalar_lea.hbm %s1349_s6, 256 }
  0x47   : > { %s246_s7 = sshll.u32 %s237_s27, 4  ;;  %p1076_p0 = scmp.ne.s32.totalorder %s1349_s6, %s1075_s14  ;;  %s1352_s7 = int_to_ptr.vmem [resolvable:$true] %s246_s7 }
  0x48   : > { %s1080_s9 = scalar_lea.hbm %s1742_s2, 512  ;;  %p1081_p13 = scmp.lt.u32.totalorder %s1349_s6, %s1742_s2 }
  0x49   : > { %p1078_p5 = pnand %p1076_p0, %p1273_p12  ;;  %p1082_p1 = scmp.lt.u32.totalorder %s1080_s9, %s1075_s14 }
  0x4a   : > { %p1084_p7 = scmp.lt.u32.totalorder %s1075_s14, %s1349_s6 }
  0x4b   : > { %p1079_p11 = pneg %p1078_p5  ;;  %p1083_p2 = por %p1082_p1, %p1081_p13 }
  0x4d   : > { %p1085_p10 = por %p1084_p7, %p1083_p2 }
  0x4f   : > { %p1086_p3 = pnand %p1085_p10, %p1079_p11 }
  0x51   : > { %1089 = shalt.err (!%p1086_p3)
}
  0x52   : > { %s1090_s29 = scalar_lea.vmem %s1352_s7, 256  ;;  %s1165_s10 = smov [#allocation10]  }
  0x53   : > { %p1091_p4 = scmp.ne.s32.totalorder %s1352_s7, %s1090_s29  ;;  %s1095_s24 = sshll.u32 %s1165_s10, 4  ;;  %s1096_s24 = int_to_ptr.vmem [resolvable:$false] %s1095_s24 }
  0x54   : > { %s1097_s27 = scalar_lea.vmem %s1096_s24, 512  ;;  %p1098_p0 = scmp.lt.s32.totalorder %s1352_s7, %s1096_s24 }
  0x55   : > { %p1093_p6 = pnand %p1091_p4, %p1273_p12  ;;  %p1099_p5 = scmp.lt.s32.totalorder %s1097_s27, %s1090_s29 }
  0x57   : > { %p1094_p8 = pneg %p1093_p6  ;;  %p1100_p13 = por %p1099_p5, %p1098_p0 }
  0x59   : > { %p1101_p1 = pnand %p1100_p13, %p1094_p8 }
  0x5b   : > { %1104 = shalt.err (!%p1101_p1)
}
  0x5c   : > { %959 = dma.hbm_to_vmem [thread:$0]  (!%p1252_p9), %s1349_s6, 256, %s1352_s7, %s1267_s11, %s1754_s12, %s1754_s12, %s1163_s15  }
  0x5d   : > { %p1755_p12 = scmp.ne.s32.totalorder %s1753_s23, 0 }
  0x5e   : > { %s260_s13 = sand.u32 (!%p1755_p12), 1, %s1143_s16   ;;  %p1756_p11 = scmp.ne.s32.totalorder (!%p1755_p12), %s1749_s25, 0 }
  0x5f   : > { %258 = sbr.rel (%p1755_p12) target bundleno = 474 (0x1da), region = 32  ;;  %s918_s14 = sshll.u32 (!%p1755_p12), %s260_s13, 4 }
  0x60   : > { %s261_s21 = scalar_lea.sflag (!%p1755_p12), [#allocation7], %s260_s13  ;;  %s264_s5 = scalar_lea.vmem (!%p1755_p12), [#allocation6], %s918_s14 }
  0x66   : > { %1130 = dma.done.wait (%p1756_p11), %s261_s21, 256  }
  0x67   : > { %1132 = vsyncadd (%p1756_p11), %s261_s21, 4294967040  ;;  %s1757_s30 = sadd.s32 4294967295, %s1159_s20   ;;  %s273_s11 = scalar_lea.vmem [#allocation8], %s918_s14 }
  0x68   : > { %s269_s9 = sand.u32 1, %s1757_s30  }
  0x69   : > { %s270_s8 = scalar_lea.sflag [#allocation9], %s269_s9 }
  0x6a   : > { %1134 = dma.done.wait (%p1756_p11), %s270_s8, 512  }
  0x6b   : > { %1136 = vsyncadd (%p1756_p11), %s270_s8, 4294966784  ;;  %v341_v0 = vlaneseq  ;;  %v331_v2 = vld [vmem:[%s264_s5] sm:$0xff]  ;;  %s282_s15 = scalar_lea.vmem [#allocation10], %s918_s14  ;;  %s1166_s23 = smov 127   ;;  %v332_v9 = vld [vmem:[%s264_s5 + $0x8] sm:$0xff]  ;;  %vm411_vm13 = vcmask 130048  }
  0x6c   : > { %v333_v3 = vld [vmem:[%s273_s11] sm:$0xff]  ;;  %v1394_v4 = vld [vmem:[%s282_s15 + $0x8] sm:$0xff]  ;;  %s1167_s25 = smov 126   ;;  %s1168_s12 = smov 124   ;;  %vm479_vm15 = vcmask 1045504  }
  0x6d   : > { %v1392_v1 = vshrl.u32 %v341_v0, 7  ;;  %v1396_v5 = vld [vmem:[%s282_s15] sm:$0xff]  ;;  %v337_v6 = vsub.f32 %v331_v2, %v333_v3  ;;  %371 = vrot.lane.b32.xlu1 %v1394_v4, %s1166_s23  ;;  %v1403_v8 = vand.u32 127, %v341_v0  ;;  %v334_v10 = vld [vmem:[%s273_s11 + $0x8] sm:$0xff]  ;;  %s1169_s6 = smov 120   ;;  %v425_v38 = vsel %vm411_vm13, %v1394_v4, 0.0 }
  0x6e   : > { %369 = vrot.lane.b32.xlu0 %v1396_v5, %s1166_s23  ;;  %v338_v11 = vsub.f32 %v332_v9, %v334_v10  ;;  %v424_v37 = vsel %vm411_vm13, %v1396_v5, 0.0  ;;  %v490_v48 = vrot.slane %v1396_v5, 2  ;;  %v491_v49 = vrot.slane %v1394_v4, 2  ;;  %p323_p9 = scmp.lt.s32.totalorder %s1151_s18, 1 }
  0x6f   : > { %v1401_v7 = vadd.s32 8, %v1392_v1  ;;  %v1408_v12 = vmul.f32 %v337_v6, %v1396_v5  ;;  %v449_v14 = vand.u32 1, %v1403_v8  ;;  %v550_v18 = vand.u32 3, %v1403_v8 }
  0x70   : > { %v1415_v15 = vmul.f32 %v338_v11, %v1394_v4  ;;  %v445_v24 = vand.u32 1, %v1392_v1  ;;  %v546_v25 = vand.u32 3, %v1392_v1  ;;  %v426_v40 = vadd.f32 %v425_v38, %v424_v37  ;;  %s1802_s18 = smov (!%p323_p9, %s1151_s18), 1 }
  0x71   : > { %468 = vrot.lane.b32.xlu1 %v1394_v4, %s1167_s25  ;;  %v446_v13 = vand.u32 1, %v1401_v7  ;;  %vm1417_vm1 = vcmp.eq.s32.totalorder %v449_v14, 0  ;;  %v547_v17 = vand.u32 3, %v1401_v7  ;;  %vm501_vm3 = vcmp.lt.s32.totalorder %v1401_v7, 14  ;;  %s921_s13 = sshll.u32 %s1802_s18, 3 }
  0x72   : > { %466 = vrot.lane.b32.xlu0 %v1396_v5, %s1167_s25  ;;  %vm1438_vm6 = vcmp.eq.s32.totalorder %v550_v18, 0  ;;  %vm602_vm8 = vcmp.lt.s32.totalorder %v1401_v7, 12  ;;  %vm447_vm10 = vcmp.eq.s32.totalorder %v445_v24, 0  ;;  %vm548_vm12 = vcmp.eq.s32.totalorder %v546_v25, 0  ;;  %s326_s9 = scalar_lea.vmem %s1743_s3, %s921_s13  ;;  %s330_s15 = scalar_lea.vmem %s1744_s4, %s921_s13 }
  0x73   : > { %vm448_vm0 = vcmp.eq.s32.totalorder %v446_v13, 0  ;;  %vm549_vm5 = vcmp.eq.s32.totalorder %v547_v17, 0  ;;  %vm1467_vm11 = vmand %vm447_vm10, %vm1417_vm1  ;;  %v480_v41 = vrot.slane %v1408_v12, 2  ;;  %v481_v42 = vrot.slane %v1415_v15, 2 }
  0x74   : > { %vm1425_vm2 = vmand %vm448_vm0, %vm1417_vm1  ;;  %v524_v27 = vsel %vm1467_vm11, %v1396_v5, 0.0  ;;  %v384_v43 = vrot.slane %v1415_v15, 1  ;;  %vm382_vm0 = vcmask 1046528   ;;  %v383_v44 = vrot.slane %v1408_v12, 1 }
  0x75   : > { %453 = vrot.lane.b32.xlu1 %v1408_v12, %s1167_s25  ;;  %vm1434_vm4 = vmand %vm501_vm3, %vm1425_vm2  ;;  %v525_v28 = vsel %vm1425_vm2, %v1394_v4, 0.0  ;;  %v526_v30 = vsel %vm411_vm13, %v524_v27, 0.0  ;;  %v482_v46 = vsel %vm479_vm15, %v480_v41, %v481_v42  ;;  %v485_v47 = vsel %vm479_vm15, %v481_v42, 0.0 }
  0x76   : > { %354 = vrot.lane.b32.xlu0 %v1408_v12, %s1166_s23  ;;  %vm1446_vm7 = vmand %vm549_vm5, %vm1438_vm6  ;;  %v527_v31 = vsel %vm411_vm13, %v525_v28, 0.0  ;;  %v388_v45 = vsel %vm382_vm0, %v384_v43, 0.0  ;;  %v394_v50 = vrot.slane %v1394_v4, 1  ;;  %v385_v51 = vsel %vm382_vm0, %v383_v44, %v384_v43 }
  0x77   : > { %vm1453_vm9 = vmand %vm602_vm8, %vm1446_vm7  ;;  %v626_v33 = vsel %vm1446_vm7, %v1394_v4, 0.0  ;;  %v528_v34 = vadd.f32 %v527_v31, %v526_v30  ;;  %v390_v52 = vsub.f32 %v388_v45, %v1415_v15  ;;  %v393_v53 = vrot.slane %v1396_v5, 1 }
  0x78   : > { %vm1479_vm14 = vmand %vm548_vm12, %vm1438_vm6  ;;  %v628_v36 = vsel %vm411_vm13, %v626_v33, 0.0  ;;  %v398_v54 = vsel %vm382_vm0, %v394_v50, 0.0  ;;  %v486_v55 = vsub.f32 %v482_v46, %v1408_v12  ;;  %v487_v56 = vsub.f32 %v485_v47, %v1415_v15 }
  0x79   : > { %455 = vrot.lane.b32.xlu1 %v1415_v15, %s1167_s25  ;;  %v625_v32 = vsel %vm1479_vm14, %v1396_v5, 0.0  ;;  %v492_v57 = vsel %vm479_vm15, %v490_v48, %v491_v49  ;;  %v495_v58 = vsel %vm479_vm15, %v491_v49, 0.0  ;;  %v389_v59 = vsub.f32 %v385_v51, %v1408_v12 }
  0x7a   : > { %356 = vrot.lane.b32.xlu0 %v1415_v15, %s1166_s23  ;;  %v627_v35 = vsel %vm411_vm13, %v625_v32, 0.0  ;;  %v581_v60 = vrot.slane %v1408_v12, 4  ;;  %v582_v61 = vrot.slane %v1415_v15, 4  ;;  %v392_v62 = vand.u32 2147483647, %v390_v52 }
  0x7b   : > { %v629_v39 = vadd.f32 %v628_v36, %v627_v35  ;;  %v395_v63 = vsel %vm382_vm0, %v393_v53, %v394_v50  ;;  %v400_v0 = vmul.f32 %v398_v54, %v1394_v4  ;;  %vm580_vm1 = vcmask 1043456  }
  0x7c   : > { %v488_v2 = vand.u32 2147483647, %v486_v55  ;;  %v489_v3 = vand.u32 2147483647, %v487_v56  ;;  %v496_v6 = vmul.f32 %v492_v57, %v1396_v5  ;;  %v497_v9 = vmul.f32 %v495_v58, %v1394_v4 }
  0x7d   : > { %556 = vrot.lane.b32.xlu1 %v1415_v15, %s1168_s12  ;;  %v583_v13 = vsel %vm580_vm1, %v581_v60, %v582_v61  ;;  %v591_v14 = vrot.slane %v1396_v5, 4  ;;  %v592_v16 = vrot.slane %v1394_v4, 4  ;;  %v391_v17 = vand.u32 2147483647, %v389_v59 }
  0x7e   : > { %554 = vrot.lane.b32.xlu0 %v1408_v12, %s1168_s12  ;;  %v399_v18 = vmul.f32 %v395_v63, %v1396_v5  ;;  %v402_v21 = vmul.f32 %v400_v0, %v392_v62  ;;  %v1526_v24 = vmul.f32 %v496_v6, %v488_v2  ;;  %v1528_v25 = vmul.f32 %v497_v9, %v489_v3 }
  0x7f   : > { %v586_v27 = vsel %vm580_vm1, %v582_v61, 0.0  ;;  %vm360_vm3 = vcmask 121856   ;;  %vm404_vm5 = vcmp.lt.s32.totalorder %v1401_v7, 15  ;;  %v587_v31 = vsub.f32 %v583_v13, %v1408_v12 }
  0x80   : > { %vm459_vm6 = vcmask 113664   ;;  %vm381_vm8 = vcmp.lt.s32.totalorder %v1403_v8, 15  ;;  %v593_v32 = vsel %vm580_vm1, %v591_v14, %v592_v16  ;;  %v596_v33 = vsel %vm580_vm1, %v592_v16, 0.0 }
  0x81   : > { %569 = vrot.lane.b32.xlu1 %v1394_v4, %s1168_s12  ;;  %vm560_vm10 = vcmask 97280   ;;  %vm478_vm12 = vcmp.lt.s32.totalorder %v1403_v8, 14  ;;  %v588_v35 = vsub.f32 %v586_v27, %v1415_v15  ;;  %v1538_v36 = vsel %vm404_vm5, %v402_v21, 0.0 }
  0x82   : > { %567 = vrot.lane.b32.xlu0 %v1396_v5, %s1168_s12  ;;  %v508_v37 = vsel %vm1467_vm11, %v1526_v24, 0.0  ;;  %v509_v38 = vsel %vm1434_vm4, %v1528_v25, 0.0  ;;  %v589_v43 = vand.u32 2147483647, %v587_v31  ;;  %v597_v44 = vmul.f32 %v593_v32, %v1396_v5  ;;  %vm1574_vm1 = vmand %vm478_vm12, %vm1467_vm11 }
  0x83   : > { %v598_v45 = vmul.f32 %v596_v33, %v1394_v4  ;;  %v651_v49 = vand.u32 7, %v1403_v8  ;;  %v590_v52 = vand.u32 2147483647, %v588_v35  ;;  %v648_v53 = vand.u32 7, %v1401_v7 }
  0x84   : > { %vm579_vm15 = vcmp.lt.s32.totalorder %v1403_v8, 12  ;;  %v681_v57 = vsub.f32 %v1415_v15, %v1408_v12  ;;  %v1578_v3 = vmul.f32 %v597_v44, %v589_v43 }
  0x85   : > { %657 = vrot.lane.b32.xlu1 %v1415_v15, %s1169_s6  ;;  %vm1580_vm5 = vcmp.eq.s32.totalorder %v651_v49, 0  ;;  %v600_v16 = vmul.f32 %v598_v45, %v590_v52  ;;  %vm1588_vm11 = vcmp.eq.s32.totalorder %v648_v53, 0  ;;  %vm1665_vm4 = vmand %vm579_vm15, %vm1446_vm7  ;;  %vm680_vm7 = vcmp.lt.s32.totalorder %v1403_v8, 8 }
  0x86   : > { %655 = vrot.lane.b32.xlu0 %v1408_v12, %s1169_s6  ;;  %v683_v19 = vand.u32 2147483647, %v681_v57 }
  0x89   : > { %670 = vrot.lane.b32.xlu1 %v1394_v4, %s1169_s6 }
  0x8a   : > { %668 = vrot.lane.b32.xlu0 %v1396_v5, %s1169_s6 }
  0xa9   : > { %529 = vadd.xlane.f32.xlu0 %v528_v34  ;;  %v401_v34 = vmul.f32 %v399_v18, %v391_v17 }
  0xad   : > { %630 = vadd.xlane.f32.xlu0 %v629_v39  ;;  %427 = vadd.xlane.f32.xlu1 %v426_v40  ;;  %v647_v39 = vand.u32 7, %v1392_v1 }
  0xaf   : > { %vm1560_vm0 = vcmp.eq.s32.totalorder %v647_v39, 0  ;;  %v685_v39 = vmul.f32 %v1394_v4, %v1396_v5 }
  0xdf   : > { %v372_v10 = vpop.permute.xlu1 %371 }
  0xe0   : > { %v370_v11 = vpop.permute.xlu0 %369  ;;  %v376_v54 = vsel %vm360_vm3, %v372_v10, 0.0 }
  0xe1   : > { %v375_v40 = vsel %vm360_vm3, %v370_v11, 0.0  ;;  %v378_v26 = vmul.f32 %v376_v54, %v1394_v4 }
  0xe2   : > { %v377_v55 = vmul.f32 %v375_v40, %v1396_v5 }
  0xe3   : > { %v469_v28 = vpop.permute.xlu1 %468 }
  0xe4   : > { %v467_v30 = vpop.permute.xlu0 %466  ;;  %v473_v58 = vsel %vm459_vm6, %v469_v28, 0.0 }
  0xe5   : > { %v472_v46 = vsel %vm459_vm6, %v467_v30, 0.0  ;;  %v475_v14 = vmul.f32 %v473_v58, %v1394_v4 }
  0xe6   : > { %v474_v59 = vmul.f32 %v472_v46, %v1396_v5  ;;  %v609_v46 = vsel %vm1479_vm14, %v1578_v3, 0.0 }
  0xe7   : > { %v454_v41 = vpop.permute.xlu1 %453 }
  0xe8   : > { %v355_v42 = vpop.permute.xlu0 %354  ;;  %v460_v47 = vsel %vm459_vm6, %v454_v41, 0.0 }
  0xe9   : > { %v361_v48 = vsel %vm360_vm3, %v355_v42, 0.0  ;;  %v462_v50 = vsub.f32 %v460_v47, %v1408_v12  ;;  %v610_v47 = vsel %vm1453_vm9, %v600_v16, 0.0  ;;  %vm1647_vm9 = vmand %vm579_vm15, %vm1479_vm14  ;;  %vm1790_vm14 = vcmask 64512  }
  0xea   : > { %v363_v51 = vsub.f32 %v361_v48, %v1408_v12 }
  0xeb   : > { %v464_v60 = vand.u32 2147483647, %v462_v50  ;;  %v456_v7 = vpop.permute.xlu1 %455 }
  0xec   : > { %v365_v61 = vand.u32 2147483647, %v363_v51  ;;  %v357_v62 = vpop.permute.xlu0 %356  ;;  %v461_v63 = vsel %vm459_vm6, %v456_v7, 0.0  ;;  %vm1598_vm6 = vmand %vm478_vm12, %vm1425_vm2 }
  0xed   : > { %v362_v0 = vsel %vm360_vm3, %v357_v62, 0.0  ;;  %v476_v9 = vmul.f32 %v474_v59, %v464_v60  ;;  %v463_v11 = vsub.f32 %v461_v63, %v1415_v15  ;;  %vm1610_vm3 = vmand %vm1560_vm0, %vm1580_vm5 }
  0xee   : > { %v379_v10 = vmul.f32 %v377_v55, %v365_v61  ;;  %v364_v13 = vsub.f32 %v362_v0, %v1415_v15  ;;  %vm654_vm2 = vmand %vm1588_vm11, %vm1580_vm5  ;;  %vm437_vm5 = vcmp.eq.s32.totalorder %v1403_v8, 0  ;;  %vm639_vm11 = vcmp.eq.s32.totalorder %v1403_v8, 2 }
  0xef   : > { %v465_v18 = vand.u32 2147483647, %v463_v11  ;;  %v557_v24 = vpop.permute.xlu1 %556  ;;  %v506_v31 = vsel %vm1574_vm1, %v476_v9, 0.0  ;;  %v714_v20 = vsel %vm654_vm2, %v1394_v4, 0.0  ;;  %vm691_vm15 = vmand %vm680_vm7, %vm1610_vm3  ;;  %vm436_vm1 = vcmp.eq.s32.totalorder %v1392_v1, 0 }
  0xf0   : > { %v366_v21 = vand.u32 2147483647, %v364_v13  ;;  %v555_v27 = vpop.permute.xlu0 %554  ;;  %v405_v28 = vsel %vm381_vm8, %v379_v10, 0.0  ;;  %v562_v32 = vsel %vm560_vm10, %v557_v24, 0.0  ;;  %v510_v45 = vadd.f32 %v508_v37, %v506_v31  ;;  %vm692_vm0 = vmand %vm680_vm7, %vm654_vm2 }
  0xf1   : > { %v561_v33 = vsel %vm560_vm10, %v555_v27, 0.0  ;;  %v477_v40 = vmul.f32 %v475_v14, %v465_v18  ;;  %v564_v42 = vsub.f32 %v562_v32, %v1415_v15  ;;  %v409_v44 = vadd.f32 %v405_v28, %v401_v34  ;;  %vm640_vm2 = vmand %vm436_vm1, %vm639_vm11 }
  0xf2   : > { %v380_v41 = vmul.f32 %v378_v26, %v366_v21  ;;  %v563_v43 = vsub.f32 %v561_v33, %v1408_v12  ;;  %v713_v37 = vsel %vm1610_vm3, %v1396_v5, 0.0  ;;  %v716_v22 = vsel %vm411_vm13, %v714_v20, 0.0 }
  0xf3   : > { %v566_v48 = vand.u32 2147483647, %v564_v42  ;;  %v570_v49 = vpop.permute.xlu1 %569  ;;  %v507_v34 = vsel %vm1598_vm6, %v477_v40, 0.0  ;;  %v412_v25 = vsel %vm411_vm13, %v409_v44, 0.0  ;;  %v715_v9 = vsel %vm411_vm13, %v713_v37, 0.0  ;;  %vm438_vm6 = vmand %vm436_vm1, %vm437_vm5 }
  0xf4   : > { %v568_v50 = vpop.permute.xlu0 %567  ;;  %v406_v51 = vsel %vm381_vm8, %v380_v41, 0.0  ;;  %v574_v23 = vsel %vm560_vm10, %v570_v49, 0.0  ;;  %v511_v54 = vadd.f32 %v509_v38, %v507_v34  ;;  %v565_v55 = vand.u32 2147483647, %v563_v43  ;;  %vm1791_vm8 = vmmov %vm1790_vm14 }
  0xf5   : > { %v573_v52 = vsel %vm560_vm10, %v568_v50, 0.0  ;;  %v410_v53 = vadd.f32 %v1538_v36, %v406_v51  ;;  %v576_v56 = vmul.f32 %v574_v23, %v1394_v4  ;;  %v512_v38 = vsel %vm411_vm13, %v510_v45, 0.0  ;;  %vm1792_vm10 = vmmov %vm1791_vm8 }
  0xf6   : > { %v575_v57 = vmul.f32 %v573_v52, %v1396_v5  ;;  %v513_v29 = vsel %vm411_vm13, %v511_v54, 0.0  ;;  %v717_v27 = vadd.f32 %v716_v22, %v715_v9  ;;  %v687_v28 = vmul.f32 %v685_v39, %v683_v19  ;;  %vm1793_vm12 = vmmov %vm1791_vm8 }
  0xf7   : > { %v413_v36 = vsel %vm411_vm13, %v410_v53, 0.0  ;;  %v578_v60 = vmul.f32 %v576_v56, %v566_v48  ;;  %v658_v7 = vpop.permute.xlu1 %657  ;;  %v514_v0 = vadd.f32 %v513_v29, %v512_v38 }
  0xf8   : > { %v577_v61 = vmul.f32 %v575_v57, %v565_v55  ;;  %v656_v62 = vpop.permute.xlu0 %655  ;;  %v414_v63 = vadd.f32 %v413_v36, %v412_v25  ;;  %v663_v2 = vsel %vm1790_vm14, %v658_v7, 0.0 }
  0xf9   : > { %v662_v3 = vsel %vm1791_vm8, %v656_v62, 0.0  ;;  %v665_v10 = vsub.f32 %v663_v2, %v1415_v15  ;;  %v608_v26 = vsel %vm1665_vm4, %v578_v60, 0.0 }
  0xfa   : > { %v664_v11 = vsub.f32 %v662_v3, %v1408_v12  ;;  %415 = vadd.xlane.f32.xlu0 %v414_v63  ;;  %v607_v13 = vsel %vm1647_vm9, %v577_v61, 0.0  ;;  %v612_v16 = vadd.f32 %v610_v47, %v608_v26  ;;  %vm727_vm9 = vcmp.eq.s32.totalorder %v1403_v8, 3 }
  0xfb   : > { %v611_v14 = vadd.f32 %v609_v46, %v607_v13  ;;  %v667_v18 = vand.u32 2147483647, %v665_v10  ;;  %v671_v21 = vpop.permute.xlu1 %670  ;;  %vm728_vm4 = vmand %vm436_vm1, %vm727_vm9 }
  0xfc   : > { %v669_v24 = vpop.permute.xlu0 %668  ;;  %v675_v15 = vsel %vm1792_vm10, %v671_v21, 0.0  ;;  %v614_v31 = vsel %vm411_vm13, %v612_v16, 0.0  ;;  %v666_v32 = vand.u32 2147483647, %v664_v11 }
  0xfd   : > { %v674_v12 = vsel %vm1793_vm12, %v669_v24, 0.0  ;;  %v613_v30 = vsel %vm411_vm13, %v611_v14, 0.0  ;;  %v677_v33 = vmul.f32 %v675_v15, %v1394_v4  ;;  %v697_v4 = vsel %vm1610_vm3, %v687_v28, 0.0 }
  0xfe   : > { %v676_v40 = vmul.f32 %v674_v12, %v1396_v5  ;;  %515 = vadd.xlane.f32.xlu0 %v514_v0  ;;  %v615_v41 = vadd.f32 %v614_v31, %v613_v30 }
  0xff   : > { %v679_v19 = vmul.f32 %v677_v33, %v667_v18 }
 0x100   : > { %v678_v39 = vmul.f32 %v676_v40, %v666_v32  ;;  %616 = vadd.xlane.f32.xlu1 %v615_v41 }
 0x101   : > { %v696_v42 = vsel %vm692_vm0, %v679_v19, 0.0 }
 0x102   : > { %718 = vadd.xlane.f32.xlu0 %v717_v27  ;;  %v695_v5 = vsel %vm691_vm15, %v678_v39, 0.0  ;;  %v702_v17 = vsel %vm411_vm13, %v696_v42, 0.0 }
 0x103   : > { %v699_v43 = vadd.f32 %v697_v4, %v695_v5 }
 0x105   : > { %v701_v44 = vsel %vm411_vm13, %v699_v43, 0.0  ;;  %vm538_vm13 = vcmp.eq.s32.totalorder %v1403_v8, 1 }
 0x106   : > { %v703_v45 = vadd.f32 %v702_v17, %v701_v44  ;;  %vm539_vm3 = vmand %vm436_vm1, %vm538_vm13 }
 0x108   : > { %704 = vadd.xlane.f32.xlu1 %v703_v45 }
 0x136   : > { %v530_v46 = vpop.xlane.xlu0 %529 }
 0x137   : > { %v531_v50 = vrot.slane %v530_v46, 4 }
 0x139   : > { %v532_v35 = vadd.f32 %v531_v50, %v530_v46 }
 0x13a   : > { %v428_v6 = vpop.xlane.xlu1 %427  ;;  %v631_v48 = vpop.xlane.xlu0 %630 }
 0x13b   : > { %v429_v47 = vrot.slane %v428_v6, 4  ;;  %v632_v51 = vrot.slane %v631_v48, 4  ;;  %v533_v55 = vrot.slane %v532_v35, 2 }
 0x13d   : > { %v430_v49 = vadd.f32 %v429_v47, %v428_v6  ;;  %v633_v52 = vadd.f32 %v632_v51, %v631_v48  ;;  %v534_v61 = vadd.f32 %v533_v55, %v532_v35 }
 0x13f   : > { %v431_v34 = vrot.slane %v430_v49, 2  ;;  %v634_v20 = vrot.slane %v633_v52, 2  ;;  %v535_v13 = vrot.slane %v534_v61, 1 }
 0x141   : > { %v432_v53 = vadd.f32 %v431_v34, %v430_v49  ;;  %v635_v3 = vadd.f32 %v634_v20, %v633_v52  ;;  %v536_v15 = vadd.f32 %v535_v13, %v534_v61 }
 0x143   : > { %v433_v36 = vrot.slane %v432_v53, 1  ;;  %v636_v21 = vrot.slane %v635_v3, 1 }
 0x145   : > { %v434_v2 = vadd.f32 %v433_v36, %v432_v53  ;;  %v637_v32 = vadd.f32 %v636_v21, %v635_v3 }
 0x187   : > { %v416_v37 = vpop.xlane.xlu0 %415 }
 0x188   : > { %v417_v23 = vrot.slane %v416_v37, 4 }
 0x18a   : > { %v418_v54 = vadd.f32 %v417_v23, %v416_v37 }
 0x18b   : > { %v516_v56 = vpop.xlane.xlu0 %515 }
 0x18c   : > { %v419_v57 = vrot.slane %v418_v54, 2  ;;  %v517_v58 = vrot.slane %v516_v56, 4 }
 0x18d   : > { %v617_v25 = vpop.xlane.xlu1 %616 }
 0x18e   : > { %v518_v38 = vadd.f32 %v517_v58, %v516_v56  ;;  %v618_v29 = vrot.slane %v617_v25, 4  ;;  %v420_v59 = vadd.f32 %v419_v57, %v418_v54 }
 0x18f   : > { %v719_v60 = vpop.xlane.xlu0 %718 }
 0x190   : > { %v519_v7 = vrot.slane %v518_v38, 2  ;;  %v619_v62 = vadd.f32 %v618_v29, %v617_v25  ;;  %v720_v63 = vrot.slane %v719_v60, 4  ;;  %v421_v0 = vrot.slane %v420_v59, 1 }
 0x192   : > { %v620_v9 = vrot.slane %v619_v62, 2  ;;  %v721_v22 = vadd.f32 %v720_v63, %v719_v60  ;;  %v422_v10 = vadd.f32 %v421_v0, %v420_v59  ;;  %v520_v11 = vadd.f32 %v519_v7, %v518_v38 }
 0x194   : > { %928 = vpush %v422_v10  ;;  %v521_v26 = vrot.slane %v520_v11, 1  ;;  %v621_v14 = vadd.f32 %v620_v9, %v619_v62  ;;  %v722_v16 = vrot.slane %v721_v22, 2 }
 0x195   : > { %930 = vpush %v434_v2  ;;  %v705_v18 = vpop.xlane.xlu1 %704 }
 0x196   : > { %v706_v24 = vrot.slane %v705_v18, 4  ;;  %v522_v27 = vadd.f32 %v521_v26, %v520_v11  ;;  %v622_v28 = vrot.slane %v621_v14, 1  ;;  %v723_v31 = vadd.f32 %v722_v16, %v721_v22 }
 0x198   : > { %v707_v12 = vadd.f32 %v706_v24, %v705_v18  ;;  %932 = vpush %v522_v27  ;;  %v623_v30 = vadd.f32 %v622_v28, %v621_v14  ;;  %v724_v41 = vrot.slane %v723_v31, 1 }
 0x199   : > { %934 = vpush %v536_v15 }
 0x19a   : > { %v708_v33 = vrot.slane %v707_v12, 2  ;;  %936 = vpush %v623_v30  ;;  %v725_v4 = vadd.f32 %v724_v41, %v723_v31 }
 0x19b   : > { %938 = vpush %v637_v32 }
 0x19c   : > { %v709_v40 = vadd.f32 %v708_v33, %v707_v12 }
 0x19e   : > { %v710_v19 = vrot.slane %v709_v40, 1 }
 0x1a0   : > { %v711_v39 = vadd.f32 %v710_v19, %v709_v40 }
 0x1a2   : > { %940 = vpush %v711_v39 }
 0x1a3   : > { %942 = vpush %v725_v4 }
 0x1c5   : > { %s929_s7 = spop %928 }
 0x1c6   : > { %s931_s28 = spop %930  ;;  %v439_v43 = vstv %s929_s7 }
 0x1c7   : > { %v442_v44 = vstv %s931_s28  ;;  %v440_v46 = vsel %vm438_vm6, %v439_v43, 0.0 }
 0x1c8   : > { %v443_v48 = vsel %vm438_vm6, %v442_v44, 0.0 }
 0x1c9   : > { %s933_s29 = spop %932 }
 0x1ca   : > { %v540_v5 = vstv %s933_s29  ;;  %s935_s10 = spop %934 }
 0x1cb   : > { %v543_v42 = vstv %s935_s10  ;;  %s937_s24 = spop %936  ;;  %v541_v17 = vsel %vm539_vm3, %v540_v5, 0.0 }
 0x1cc   : > { %s939_s27 = spop %938  ;;  %v544_v45 = vsel %vm539_vm3, %v543_v42, 0.0  ;;  %v641_v6 = vstv %s937_s24  ;;  %v542_v49 = vadd.f32 %v541_v17, %v440_v46 }
 0x1cd   : > { %v644_v47 = vstv %s939_s27  ;;  %v545_v50 = vadd.f32 %v544_v45, %v443_v48  ;;  %v642_v51 = vsel %vm640_vm2, %v641_v6, 0.0 }
 0x1ce   : > { %v645_v34 = vsel %vm640_vm2, %v644_v47, 0.0  ;;  %v643_v35 = vadd.f32 %v642_v51, %v542_v49 }
 0x1cf   : > { %v646_v23 = vadd.f32 %v645_v34, %v545_v50 }
 0x1d3   : > { %s941_s14 = spop %940 }
 0x1d4   : > { %v729_v37 = vstv %s941_s14  ;;  %s943_s21 = spop %942 }
 0x1d5   : > { %v730_v52 = vsel %vm728_vm4, %v729_v37, 0.0  ;;  %v732_v8 = vstv %s943_s21 }
 0x1d6   : > { %v731_v53 = vadd.f32 %v730_v52, %v643_v35  ;;  %v733_v54 = vsel %vm728_vm4, %v732_v8, 0.0 }
 0x1d7   : > { %v734_v55 = vadd.f32 %v733_v54, %v646_v23 }
 0x1d8   : > { %745 = vst [vmem:[%s326_s9] sm:$0xff] %v731_v53 }
 0x1d9   : > { %747 = vst [vmem:[%s330_s15] sm:$0xff] %v734_v55 }
 0x1da PF: > { %s21_s20 = sadd.s32 1, %s1159_s20   ;;  %s1794_s15 = smov %s1143_s16 }
 0x1db   : > { %p18_p2 = scmp.ge.s32.totalorder %s21_s20, 4   ;;  %s1795_s16 = smov %s1147_s17 }
 0x1dc   : > { %s1796_s17 = smov %s1242_s26  ;;  %s1797_s18 = smov %s1155_s19 }
 0x1dd   : > { %s1798_s19 = smov %s1800_s22  ;;  %20 = sbr.rel (!%p18_p2) target bundleno = 6 (0x6), region = 116 }
 0x1e4   :  { %781 = vsyncpa [#allocation7], 1 }
 0x1e5   :  { %783 = vsyncpa [#allocation7 + $0x1], 1 }
 0x1e6   :  { %784 = vsyncpa [#allocation9], 1 }
 0x1e7   :  { %786 = vsyncpa [#allocation9 + $0x1], 1 }

</bundles_post_ra>
